<compile_context>
chip_gen: v7x
topology: tpu7x:2x2x1
jax: 0.10.0
libtpu: 0.0.40
codegen_flags: <defaults>
</compile_context>

<pallas_src>
import jax
import jax.numpy as jnp
from jax.experimental import pallas as pl
from jax.experimental.pallas import tpu as pltpu


def _round_up(x: int, m: int) -> int:
    return (x + m - 1) // m * m


def adaln_zero_kernel(y_ref, w_ref, b_ref, o_ref, acc_ref):
    """One (tm, tn) output tile; K (=E) reduction is the last grid axis."""
    k = pl.program_id(2)

    @pl.when(k == 0)
    def _():
        acc_ref[...] = jnp.zeros_like(acc_ref)

    # bf16 x bf16 -> f32 accumulation on the MXU.
    acc_ref[...] += jnp.dot(
        y_ref[...], w_ref[...], preferred_element_type=jnp.float32
    )

    @pl.when(k == pl.num_programs(2) - 1)
    def _():
        # Bias add in f32 on the VPU, then cast once on the store.
        o_ref[...] = (acc_ref[...] + b_ref[...]).astype(o_ref.dtype)


def adaln_zero(y, w, b, chunks, *, compute_dtype=jnp.bfloat16,
               tm_target=256, tn_target=512, tk_target=512):
    """AdaLN-Zero forward.

    y: (B, E) conditioning input.
    w: (chunks*E, E)  -- PyTorch nn.Linear weight layout.
    b: (chunks*E,)    -- PyTorch nn.Linear bias.
    Returns: tuple of `chunks` arrays, each (B, 1, E)
             (matches y[:, None, :].chunk(chunks, dim=-1)).
    """
    B, E = y.shape
    out_dim = chunks * E
    assert w.shape == (out_dim, E)
    assert b.shape == (out_dim,)
    out_dtype = y.dtype

    # ---- pad shapes to (sublane, lane)-aligned, tile-divisible sizes --------
    sub = 16 if compute_dtype == jnp.bfloat16 else 8   # bf16 packs 16 sublanes
    Bp = _round_up(B, sub)
    tm = min(tm_target, Bp)
    Bp = _round_up(Bp, tm)

    Ep = _round_up(E, 128)
    tk = min(tk_target, Ep)
    Ep = _round_up(Ep, tk)

    Np = _round_up(out_dim, 128)
    tn = min(tn_target, Np)
    Np = _round_up(Np, tn)

    # ---- operand prep: bf16 activations/weights, f32 bias -------------------
    y_p = jnp.pad(y.astype(compute_dtype), ((0, Bp - B), (0, Ep - E)))
    w_t_p = jnp.pad(w.T.astype(compute_dtype), ((0, Ep - E), (0, Np - out_dim)))
    b_p = jnp.pad(b.astype(jnp.float32), (0, Np - out_dim)).reshape(1, Np)

    grid = (Bp // tm, Np // tn, Ep // tk)

    out_itemsize = jnp.dtype(out_dtype).itemsize
    cost = pl.CostEstimate(
        flops=2 * Bp * Ep * Np,
        transcendentals=0,
        bytes_accessed=(y_p.size * y_p.dtype.itemsize
                        + w_t_p.size * w_t_p.dtype.itemsize
                        + b_p.size * 4
                        + Bp * Np * out_itemsize),
    )

    out = pl.pallas_call(
        adaln_zero_kernel,
        out_shape=jax.ShapeDtypeStruct((Bp, Np), out_dtype),
        grid_spec=pltpu.PrefetchScalarGridSpec(
            num_scalar_prefetch=0,
            grid=grid,
            in_specs=[
                pl.BlockSpec((tm, tk), lambda i, j, k: (i, k)),   # y tile
                pl.BlockSpec((tk, tn), lambda i, j, k: (k, j)),   # W^T tile (streamed)
                pl.BlockSpec((1, tn), lambda i, j, k: (0, j)),    # bias tile
            ],
            out_specs=pl.BlockSpec((tm, tn), lambda i, j, k: (i, j)),
            scratch_shapes=[pltpu.VMEM((tm, tn), jnp.float32)],   # f32 accumulator
        ),
        compiler_params=pltpu.CompilerParams(
            dimension_semantics=("parallel", "parallel", "arbitrary"),
            vmem_limit_bytes=48 * 1024 * 1024,  # fits v7x's 64 MiB physical VMEM
        ),
        cost_estimate=cost,
    )(y_p, w_t_p, b_p)

    # Single lane-dense slab -> one reshape (row-major view); chunk i of the
    # PyTorch .chunk() is exactly columns [i*E, (i+1)*E).
    out = out[:B, :out_dim].reshape(B, chunks, 1, E)
    # Tuple unpack only for PyTorch-parity; downstream code should prefer the slab.
    return tuple(out[:, i] for i in range(chunks))


if __name__ == "__main__":
    B = 2
    EMB_DIM = 32
    CHUNKS = 6

    key = jax.random.PRNGKey(0)
    k_y, k_w, k_b = jax.random.split(key, 3)

    # Deterministic params (PyTorch nn.Linear default init: U(-1/sqrt(E), 1/sqrt(E))).
    bound = 1.0 / (EMB_DIM ** 0.5)
    w = jax.random.uniform(k_w, (CHUNKS * EMB_DIM, EMB_DIM), jnp.float32, -bound, bound)
    b = jax.random.uniform(k_b, (CHUNKS * EMB_DIM,), jnp.float32, -bound, bound)
    y = jax.random.normal(k_y, (B, EMB_DIM), jnp.float32)

    outs = adaln_zero(y, w, b, CHUNKS)
    outs = jax.block_until_ready(outs)

    # Reference check against plain JAX (f32). bf16 compute inputs + f32
    # accumulation -> loosen tolerance vs the pure-f32 reference.
    ref_full = (y @ w.T + b)[:, None, :]
    ref = tuple(ref_full[:, :, i * EMB_DIM:(i + 1) * EMB_DIM] for i in range(CHUNKS))
    assert len(outs) == CHUNKS
    for o, r in zip(outs, ref):
        assert o.shape == (B, 1, EMB_DIM)
        assert jnp.allclose(o, r, atol=1e-2, rtol=1e-2), float(jnp.max(jnp.abs(o - r)))

    print("KERNEL_OK")
</pallas_src>

<mosaic_0001>
module attributes {stable_mosaic.version = 11 : i64} {
  func.func @adaln_zero_kernel(%arg0: i32, %arg1: i32, %arg2: i32, %arg3: memref<16x128xbf16, #tpu.memory_space<vmem>>, %arg4: memref<128x256xbf16, #tpu.memory_space<vmem>>, %arg5: memref<1x256xf32, #tpu.memory_space<vmem>>, %arg6: memref<16x256xf32, #tpu.memory_space<vmem>>, %arg7: memref<16x256xf32, #tpu.memory_space<vmem>>) attributes {dimension_semantics = [#tpu.dimension_semantics<parallel>, #tpu.dimension_semantics<parallel>, #tpu.dimension_semantics<arbitrary>], iteration_bounds = array<i64: 1, 1, 1>, scalar_prefetch = 0 : i64, scratch_operands = 1 : i64, tpu.core_type = #tpu.core_type<tc>, window_params = [{transform_indices = @transform_0, window_bounds = array<i64: 16, 128>}, {transform_indices = @transform_1, window_bounds = array<i64: 128, 256>}, {transform_indices = @transform_2, window_bounds = array<i64: 1, 256>}, {transform_indices = @transform_3, window_bounds = array<i64: 16, 256>}]} {
    %c0_i32 = arith.constant 0 : i32
    %0 = arith.cmpi eq, %arg2, %c0_i32 : i32
    %1 = arith.extui %0 : i1 to i32
    %c0_i32_0 = arith.constant 0 : i32
    %2 = arith.cmpi ne, %1, %c0_i32_0 : i32
    scf.if %2 {
      %cst_10 = arith.constant 0.000000e+00 : f32
      %12 = vector.broadcast %cst_10 : f32 to vector<16x256xf32>
      %c0_11 = arith.constant 0 : index
      %c0_12 = arith.constant 0 : index
      %13 = vector.load %arg7[%c0_11, %c0_12] : memref<16x256xf32, #tpu.memory_space<vmem>>, vector<16x256xf32>
      tpu.vector_store %arg7[%c0_11, %c0_12], %12 {strides = array<i32>} : memref<16x256xf32, #tpu.memory_space<vmem>>, vector<16x256xf32>,
    } else {
    }
    %c0 = arith.constant 0 : index
    %c0_1 = arith.constant 0 : index
    %3 = vector.load %arg7[%c0, %c0_1] : memref<16x256xf32, #tpu.memory_space<vmem>>, vector<16x256xf32>
    %c0_2 = arith.constant 0 : index
    %c0_3 = arith.constant 0 : index
    %4 = vector.load %arg3[%c0_2, %c0_3] : memref<16x128xbf16, #tpu.memory_space<vmem>>, vector<16x128xbf16>
    %c0_4 = arith.constant 0 : index
    %c0_5 = arith.constant 0 : index
    %5 = vector.load %arg4[%c0_4, %c0_5] : memref<128x256xbf16, #tpu.memory_space<vmem>>, vector<128x256xbf16>
    %cst = arith.constant dense<0.000000e+00> : vector<16x256xf32>
    %6 = tpu.matmul %4, %5, %cst {dimension_numbers = #tpu.dot_dimension_numbers<[1], [0], [0], [1], [0, 0, 1, 1], [], []>} : vector<16x128xbf16>, vector<128x256xbf16>, vector<16x256xf32> -> vector<16x256xf32>
    %7 = arith.addf %3, %6 : vector<16x256xf32>
    %c0_6 = arith.constant 0 : index
    %c0_7 = arith.constant 0 : index
    %8 = vector.load %arg7[%c0_6, %c0_7] : memref<16x256xf32, #tpu.memory_space<vmem>>, vector<16x256xf32>
    tpu.vector_store %arg7[%c0_6, %c0_7], %7 {strides = array<i32>} : memref<16x256xf32, #tpu.memory_space<vmem>>, vector<16x256xf32>,
    %c0_i32_8 = arith.constant 0 : i32
    %9 = arith.cmpi eq, %arg2, %c0_i32_8 : i32
    %10 = arith.extui %9 : i1 to i32
    %c0_i32_9 = arith.constant 0 : i32
    %11 = arith.cmpi ne, %10, %c0_i32_9 : i32
    scf.if %11 {
      %c0_10 = arith.constant 0 : index
      %c0_11 = arith.constant 0 : index
      %12 = vector.load %arg7[%c0_10, %c0_11] : memref<16x256xf32, #tpu.memory_space<vmem>>, vector<16x256xf32>
      %c0_12 = arith.constant 0 : index
      %c0_13 = arith.constant 0 : index
      %13 = vector.load %arg5[%c0_12, %c0_13] : memref<1x256xf32, #tpu.memory_space<vmem>>, vector<1x256xf32>
      %14 = vector.broadcast %13 : vector<1x256xf32> to vector<16x256xf32>
      %15 = arith.addf %12, %14 : vector<16x256xf32>
      %c0_14 = arith.constant 0 : index
      %c0_15 = arith.constant 0 : index
      %16 = vector.load %arg6[%c0_14, %c0_15] : memref<16x256xf32, #tpu.memory_space<vmem>>, vector<16x256xf32>
      tpu.vector_store %arg6[%c0_14, %c0_15], %15 {strides = array<i32>} : memref<16x256xf32, #tpu.memory_space<vmem>>, vector<16x256xf32>,
    } else {
    }
    return
  }
  func.func @transform_0(%arg0: i32, %arg1: i32, %arg2: i32) -> (i32, i32) {
    %c0_i32 = arith.constant 0 : i32
    return %arg0, %arg2 : i32, i32
  }
  func.func @transform_1(%arg0: i32, %arg1: i32, %arg2: i32) -> (i32, i32) {
    %c0_i32 = arith.constant 0 : i32
    return %arg2, %arg1 : i32, i32
  }
  func.func @transform_2(%arg0: i32, %arg1: i32, %arg2: i32) -> (i32, i32) {
    %c0_i32 = arith.constant 0 : i32
    %c0_i32_0 = arith.constant 0 : i32
    return %c0_i32, %arg1 : i32, i32
  }
  func.func @transform_3(%arg0: i32, %arg1: i32, %arg2: i32) -> (i32, i32) {
    %c0_i32 = arith.constant 0 : i32
    return %arg0, %arg1 : i32, i32
  }
}

</mosaic_0001>

<bundles_post_ra>
// kernel: tpu_custom_call.1
= control target key start
LH: loop header
LB: loop body
LE: loop exit
PB: predicated region body
PF: predicated region fallthrough
CT: control target
= control target key end

     0   :  { %8 = vsyncpa [#allocation4], 0  ;;  %s449_s0 = inlined_call_operand.hbm [shape: bf16[16,128], index: 0, kind: input, shape index: {}]   ;;  %s450_s1 = inlined_call_operand.hbm [shape: bf16[128,256], index: 1, kind: input, shape index: {}]   ;;  %s451_s2 = inlined_call_operand.vmem [shape: f32[1,256], index: 2, kind: input, shape index: {}]   ;;  %s452_s3 = inlined_call_operand.hbm [shape: f32[16,256], index: 3, kind: output, shape index: {}]  }
   0x1   :  { %9 = vsyncpa [#allocation7], 0 }
   0x2   :  { %10 = vsyncpa [#allocation5], 0  ;;  %s380_s12 = smov [#allocation3]   ;;  %s308_s16 = scalar_lea.hbm %s449_s0, 128 }
   0x3   :  { %s16_s13 = sshll.u32 %s380_s12, 4  ;;  %p309_p0 = scmp.ne.s32.totalorder %s449_s0, %s308_s16  ;;  %s17_s13 = int_to_ptr.vmem [resolvable:$true] %s16_s13 }
   0x4   :  { %p312_p1 = scmp.lt.u32.totalorder %s308_s16, %s449_s0 }
   0x6   :  { %p314_p2 = pnand %p312_p1, %p309_p0 }
   0x8   :  { %317 = shalt.err (!%p314_p2)
}
   0x9   :  { %s318_s21 = scalar_lea.vmem %s17_s13, 128  ;;  %p323_p4 = scmp.lt.s32.totalorder %s17_s13, %s17_s13 }
   0xa   :  { %p319_p3 = scmp.ne.s32.totalorder %s17_s13, %s318_s21  ;;  %p324_p5 = scmp.lt.s32.totalorder %s318_s21, %s318_s21 }
   0xc   :  { %p325_p6 = por %p324_p5, %p323_p4 }
   0xe   :  { %p326_p7 = pnand %p325_p6, %p319_p3 }
  0x10   :  { %329 = shalt.err (!%p326_p7)
}
  0x11   :  { %s381_s22 = smov 64   ;;  %s382_s23 = smov 4  }
  0x12   :  { %22 = dma.hbm_to_vmem [thread:$0]  %s449_s0, 128, %s17_s13, [#allocation4], %s381_s22, %s381_s22, %s382_s23  }
  0x13   :  { %s383_s26 = smov [#allocation6]   ;;  %s330_s30 = scalar_lea.hbm %s450_s1, 2048 }
  0x14   :  { %s28_s27 = sshll.u32 %s383_s26, 4  ;;  %p331_p8 = scmp.ne.s32.totalorder %s450_s1, %s330_s30  ;;  %s29_s27 = int_to_ptr.vmem [resolvable:$true] %s28_s27 }
  0x15   :  { %p334_p9 = scmp.lt.u32.totalorder %s330_s30, %s450_s1 }
  0x17   :  { %p336_p10 = pnand %p334_p9, %p331_p8 }
  0x19   :  { %339 = shalt.err (!%p336_p10)
}
  0x1a   :  { %s340_s8 = scalar_lea.vmem %s29_s27, 2048  ;;  %p345_p12 = scmp.lt.s32.totalorder %s29_s27, %s29_s27 }
  0x1b   :  { %p341_p11 = scmp.ne.s32.totalorder %s29_s27, %s340_s8  ;;  %p346_p13 = scmp.lt.s32.totalorder %s340_s8, %s340_s8 }
  0x1d   :  { %p347_p0 = por %p346_p13, %p345_p12 }
  0x1f   :  { %p348_p1 = pnand %p347_p0, %p341_p11 }
  0x21   :  { %351 = shalt.err (!%p348_p1)
}
  0x22   :  { %s384_s0 = smov 128   ;;  %s385_s9 = smov 8  }
  0x23   :  { %34 = dma.hbm_to_vmem [thread:$0]  %s450_s1, 2048, %s29_s27, [#allocation7], %s384_s0, %s384_s0, %s385_s9  }
  0x24   :  { %374 = dma.done.wait [#allocation4], 128  }
  0x25   :  { %375 = vsyncadd [#allocation4], 4294967168 }
  0x26   :  { %376 = dma.done.wait [#allocation7], 2048  }
  0x27   :  { %377 = vsyncadd [#allocation7], 4294965248  ;;  %v386_v0 = vmov 0   ;;  %v283_v1 = vld [vmem:[#allocation6 + $0x4] ss:$8 sps:$4 sm:$0xff]   ;;  %v307_v17 = vld [vmem:[#allocation3] sm:$0xff]   ;;  %v220_v18 = vlaneseq }
  0x28   :  { %192 = vmatprep.mubr.bf16.mxu0 %v386_v0  ;;  %v285_v2 = vld [vmem:[#allocation6] ss:$8 sps:$4 sm:$0xff]   ;;  %160 = vmatprep.subr.bf16.mxu0 %v283_v1  ;;  %v286_v3 = vld [vmem:[#allocation6 + $0x14] ss:$8 sps:$4 sm:$0xff]   ;;  %v288_v4 = vld [vmem:[#allocation6 + $0x10] ss:$8 sps:$4 sm:$0xff]  }
  0x29   :  { %161 = vmatpush1.bf16.msra.mxu0 %v285_v2  ;;  %v289_v5 = vld [vmem:[#allocation6 + $0x24] ss:$8 sps:$4 sm:$0xff]   ;;  %v291_v6 = vld [vmem:[#allocation6 + $0x20] ss:$8 sps:$4 sm:$0xff]   ;;  %v292_v7 = vld [vmem:[#allocation6 + $0x34] ss:$8 sps:$4 sm:$0xff]  }
  0x2a   :  { %162 = vmatprep.subr.bf16.mxu0 %v286_v3  ;;  %v294_v8 = vld [vmem:[#allocation6 + $0x30] ss:$8 sps:$4 sm:$0xff]   ;;  %v295_v9 = vld [vmem:[#allocation6 + $0x44] ss:$8 sps:$4 sm:$0xff]   ;;  %v297_v10 = vld [vmem:[#allocation6 + $0x40] ss:$8 sps:$4 sm:$0xff]  }
  0x2b   :  { %v298_v11 = vld [vmem:[#allocation6 + $0x54] ss:$8 sps:$4 sm:$0xff]   ;;  %v300_v12 = vld [vmem:[#allocation6 + $0x50] ss:$8 sps:$4 sm:$0xff]   ;;  %v301_v13 = vld [vmem:[#allocation6 + $0x64] ss:$8 sps:$4 sm:$0xff]  }
  0x2c   :  { %v303_v14 = vld [vmem:[#allocation6 + $0x60] ss:$8 sps:$4 sm:$0xff]   ;;  %v304_v15 = vld [vmem:[#allocation6 + $0x74] ss:$8 sps:$4 sm:$0xff]   ;;  %v306_v16 = vld [vmem:[#allocation6 + $0x70] ss:$8 sps:$4 sm:$0xff]  }
  0x2d   :  { %163 = vmatpush1.bf16.msra.mxu0 %v288_v4  ;;  %v221_v19 = vshrl.u32 %v220_v18, 7  ;;  %v218_v21 = vld [vmem:[%s451_s2] sm:$0x3]  ;;  %s387_s13 = smov [#allocation8]  }
  0x2e   :  { %164 = vmatprep.subr.bf16.mxu0 %v289_v5  ;;  %s243_s14 = sshll.u32 %s387_s13, 4  ;;  %s244_s14 = int_to_ptr.vmem [resolvable:$true] %s243_s14 }
  0x2f   :  { %v222_v20 = vsub.s32 0, %v221_v19  ;;  %v226_v22 = vsub.s32 1, %v221_v19  ;;  %s352_s15 = scalar_lea.vmem %s244_s14, 512  ;;  %p357_p3 = scmp.lt.s32.totalorder %s244_s14, %s244_s14 }
  0x30   :  { %p353_p2 = scmp.ne.s32.totalorder %s244_s14, %s352_s15  ;;  %p358_p4 = scmp.lt.s32.totalorder %s352_s15, %s352_s15 }
  0x31   :  { %165 = vmatpush1.bf16.msra.mxu0 %v291_v6  ;;  %v223_v23 = vrot.slane %v218_v21, %v222_v20  ;;  %v227_v24 = vrot.slane %v218_v21, %v226_v22 }
  0x32   :  { %166 = vmatprep.subr.bf16.mxu0 %v292_v7  ;;  %p359_p5 = por %p358_p4, %p357_p3 }
  0x34   :  { %p360_p6 = pnand %p359_p5, %p353_p2 }
  0x35   :  { %167 = vmatpush1.bf16.msra.mxu0 %v294_v8 }
  0x36   :  { %168 = vmatprep.subr.bf16.mxu0 %v295_v9 }
  0x39   :  { %169 = vmatpush1.bf16.msra.mxu0 %v297_v10 }
  0x3a   :  { %170 = vmatprep.subr.bf16.mxu0 %v298_v11 }
  0x3d   :  { %171 = vmatpush1.bf16.msra.mxu0 %v300_v12 }
  0x3e   :  { %172 = vmatprep.subr.bf16.mxu0 %v301_v13 }
  0x41   :  { %173 = vmatpush1.bf16.msra.mxu0 %v303_v14 }
  0x42   :  { %174 = vmatprep.subr.bf16.mxu0 %v304_v15 }
  0x45   :  { %175 = vmatpush1.bf16.msra.mxu0 %v306_v16 }
  0x48   :  { %193 = vmatmul.mubr.bf16.vlgmr.msra.gmra.mrb[0].mxu0 %v307_v17 }
 0x11b   :  { %v194_v25 = vpop.f32.mrb[0].mxu0 }
 0x11c   :  { %v230_v26 = vadd.f32 %v223_v23, %v194_v25  ;;  %v196_v27 = vpop.f32.mrb[1].mxu0 }
 0x11d   :  { %v231_v28 = vadd.f32 %v227_v24, %v196_v27  ;;  %v198_v29 = vpop.f32.mrb[2].mxu0 }
 0x11e   :  { %234 = vst [vmem:[#allocation8] sm:$0xff] %v230_v26  ;;  %v232_v30 = vadd.f32 %v223_v23, %v198_v29  ;;  %v200_v31 = vpop.f32.mrb[3].mxu0 }
 0x11f   :  { %235 = vst [vmem:[#allocation8 + $0x8] sm:$0xff] %v231_v28  ;;  %v233_v32 = vadd.f32 %v227_v24, %v200_v31 }
 0x120   :  { %236 = vst [vmem:[#allocation8 + $0x10] sm:$0xff] %v232_v30 }
 0x121   :  { %237 = vst [vmem:[#allocation8 + $0x18] sm:$0xff] %v233_v32 }
 0x122   :  { %363 = shalt.err (!%p360_p6)
}
 0x123   :  { %s364_s17 = scalar_lea.hbm %s452_s3, 512 }
 0x124   :  { %p365_p7 = scmp.ne.s32.totalorder %s452_s3, %s364_s17  ;;  %p368_p8 = scmp.lt.u32.totalorder %s364_s17, %s452_s3 }
 0x126   :  { %p370_p9 = pnand %p368_p8, %p365_p7 }
 0x128   :  { %373 = shalt.err (!%p370_p9)
}
 0x129   :  { %s388_s22 = smov 256   ;;  %s389_s23 = smov 16  }
 0x12a   :  { %249 = dma.vmem_to_hbm [thread:$0]  %s244_s14, 512, %s452_s3, [#allocation5], %s388_s22, %s388_s22, %s389_s23  }
 0x12b   :  { %378 = dma.done.wait [#allocation5], 512  }
 0x12c   :  { %379 = vsyncadd [#allocation5], 4294966784 }
 0x12d   :  { %253 = vsyncpa [#allocation4], 1 }
 0x12e   :  { %254 = vsyncpa [#allocation7], 1 }
 0x12f   :  { %255 = vsyncpa [#allocation5], 1 }

</bundles_post_ra>
